<compile_context>
chip_gen: v7x
topology: tpu7x:2x2x1
jax: 0.10.0
libtpu: 0.0.40
codegen_flags: <defaults>
</compile_context>

<pallas_src>
import functools
import math

import jax
import jax.numpy as jnp
from jax.experimental import pallas as pl
from jax.experimental.pallas import tpu as pltpu

_LANES = 128


# ---------------------------------------------------------------------------
# Kernel
# ---------------------------------------------------------------------------
def _msl_kernel(x_ref, w_ref, mods_ref, o_ref, *, apply_sine, tiny_k,
                precision):
    """o = [sin](scale' * (x @ wT) + shift')  -- bias/FiLM/w0 pre-folded."""
    if tiny_k:
        # dim_in is tiny (2-3 coordinate features): an MXU dot would be
        # ~K/128 utilized, so do the projection as a VPU outer-product sum.
        x = x_ref[...].astype(jnp.float32)
        w = w_ref[...].astype(jnp.float32)
        acc = x[:, 0:1] * w[0:1, :]
        for k in range(1, x.shape[1]):
            acc = acc + x[:, k:k + 1] * w[k:k + 1, :]
    else:
        acc = jnp.dot(x_ref[...], w_ref[...],
                      preferred_element_type=jnp.float32,
                      precision=precision)
    mods = mods_ref[...]                        # (2, tn) f32: [scale'; shift']
    y = mods[0:1, :] * acc + mods[1:2, :]
    if apply_sine:
        y = jnp.sin(y)
    o_ref[...] = y.astype(o_ref.dtype)


# ---------------------------------------------------------------------------
# Tile sizing helpers
# ---------------------------------------------------------------------------
def _round_up(a, b):
    return ((a + b - 1) // b) * b


def _cdiv(a, b):
    return (a + b - 1) // b


def _sublane_multiple(dtype):
    # f32 -> 8 sublanes / vreg, bf16 -> 16, int8/fp8 -> 32.
    return max(8, 32 // jnp.dtype(dtype).itemsize)


def _vmem_limit_bytes():
    """Generation-aware scoped-VMEM limit (128 MiB parts vs v7x's 64 MiB)."""
    try:
        cap = int(pltpu.get_tpu_info().vmem_capacity_bytes)
    except Exception:
        cap = 128 * 1024 * 1024
    if cap >= 96 * 1024 * 1024:            # v5e / v6e: 128 MiB physical VMEM
        return 96 * 1024 * 1024
    return 48 * 1024 * 1024                # v7x: 64 MiB physical VMEM per TC


def _choose_tn(n_pad, dim_in, w_itemsize, limit):
    """Feature-axis block: full width while the weight comfortably stays
    resident in VMEM, otherwise ~8 MiB blocks in 128-lane multiples."""
    full_bytes = dim_in * n_pad * w_itemsize
    if full_bytes <= min(20 * 1024 * 1024, limit // 3):
        return n_pad
    # TODO(synk): per-generation tn (128 on v5e's 4x128^2 MXU, 256+ on v6e/v7x).
    tn = ((8 * 1024 * 1024) // max(dim_in * w_itemsize, 1)) // _LANES * _LANES
    return int(min(max(tn, 256), n_pad))


def _choose_tm(M, dim_in, tn, x_itemsize, o_itemsize, sub, budget):
    """Row tile: as large as the x/out double-buffer budget allows, capped at
    1024 rows and so the grid keeps >= 2 row blocks (v7x megacore split)."""
    per_row = 2 * (dim_in * x_itemsize + tn * o_itemsize)   # double-buffered
    tm = budget // max(per_row, 1)
    tm = min(tm, 1024, _round_up(M, sub))
    if M > sub:
        tm = min(tm, _round_up(_cdiv(M, 2), sub))
    tm = max((tm // sub) * sub, sub)
    return int(tm)


# ---------------------------------------------------------------------------
# Host-side parameter folding (done once per layer, not per forward)
# ---------------------------------------------------------------------------
def prepare_siren_params(weight, bias, scale=None, shift=None, *, w0=1.0,
                         is_last=False, apply_activation=True):
    """Fold bias / FiLM / w0 into (W^T, [scale'; shift'], apply_sine).

      y = x @ W.T + b
      is_last:                y + 0.5             -> a = 1,    b' = b + 0.5 (no sin)
      modulated (+sine):      sin(w0*(s*y + t))   -> a = w0*s, b' = w0*(s*b + t)
      modulated, no sine:     s*y + t             -> a = s,    b' = s*b + t
      plain (+sine):          sin(w0*y)           -> a = w0,   b' = w0*b
    so the kernel epilogue is always  [sin](a*acc + b').
    """
    weight = jnp.asarray(weight)
    dim_out, dim_in = weight.shape
    f32 = jnp.float32
    b = jnp.broadcast_to(jnp.asarray(bias, f32).reshape(-1), (dim_out,))

    def _film_vec(v, name, fill):
        if v is None:
            return jnp.full((dim_out,), fill, f32)
        v = jnp.asarray(v, f32).reshape(-1)
        if v.shape[0] not in (1, dim_out):
            raise ValueError(
                f"FiLM {name} has {v.shape[0]} features but the linear output "
                f"has {dim_out}; the reference module's modulated path "
                f"requires dim_in == dim_out.")
        return jnp.broadcast_to(v, (dim_out,))

    if is_last:
        eff_scale = jnp.ones((dim_out,), f32)
        eff_shift = b + 0.5
        apply_sine = False
    else:
        s = _film_vec(scale, "scale", 1.0)
        t = _film_vec(shift, "shift", 0.0)
        eff_scale = s
        eff_shift = s * b + t
        apply_sine = bool(apply_activation)
        if apply_sine:
            eff_scale = float(w0) * eff_scale
            eff_shift = float(w0) * eff_shift

    # Lane-dense output: pad tiny heads (dim_out < 128, e.g. RGB) to a full
    # 128-lane slab so every row tile gets unmasked stores; sliced off outside.
    # TODO(synk): repack several tiny heads into one 128-lane slab instead.
    n_pad = _round_up(dim_out, _LANES) if dim_out < _LANES else dim_out
    wT = weight.T                                      # (dim_in, dim_out)
    mods = jnp.stack([eff_scale, eff_shift], axis=0)   # (2, dim_out) f32
    if n_pad != dim_out:
        wT = jnp.pad(wT, ((0, 0), (0, n_pad - dim_out)))
        mods = jnp.pad(mods, ((0, 0), (0, n_pad - dim_out)))
    return wT, mods, apply_sine, dim_out


# ---------------------------------------------------------------------------
# Fused forward on pre-packed parameters
# ---------------------------------------------------------------------------
def siren_fused_forward(x, wT, mods, *, apply_sine, dim_out, precision=None,
                        tm=None, tn=None, tiny_k_threshold=8):
    orig_shape = x.shape
    dim_in, n_pad = wT.shape
    if orig_shape[-1] != dim_in:
        raise ValueError(
            f"x feature dim {orig_shape[-1]} != weight dim_in {dim_in}")
    x2d = x.reshape(-1, dim_in)
    M = x2d.shape[0]
    out_dtype = x.dtype
    x_isz = jnp.dtype(x.dtype).itemsize
    w_isz = jnp.dtype(wT.dtype).itemsize
    o_isz = jnp.dtype(out_dtype).itemsize
    sub = _sublane_multiple(out_dtype)

    limit = _vmem_limit_bytes()
    if tn is None:
        tn = _choose_tn(n_pad, dim_in, w_isz, limit)
    tn = int(min(tn, n_pad))
    n_col_blocks = _cdiv(n_pad, tn)

    # Resident (constant-index) weight/mods: single-buffer big ones so v7x's
    # 64 MiB VMEM keeps headroom for large row tiles.
    resident = n_col_blocks == 1
    w_block_bytes = dim_in * tn * w_isz
    use_buffered = resident and w_block_bytes > (4 * 1024 * 1024)
    n_w_bufs = 1 if use_buffered else 2
    fixed = n_w_bufs * w_block_bytes + 2 * (2 * tn * 4)
    budget = max(limit - fixed - (2 * 1024 * 1024), 2 * 1024 * 1024)
    if tm is None:
        tm = _choose_tm(M, dim_in, tn, x_isz, o_isz, sub, budget)
    n_row_blocks = _cdiv(M, tm)                      # ragged last block, no pad

    tiny_k = dim_in <= tiny_k_threshold
    kernel = functools.partial(_msl_kernel, apply_sine=apply_sine,
                               tiny_k=tiny_k, precision=precision)

    cost = pl.CostEstimate(
        flops=2 * M * dim_in * n_pad,
        transcendentals=(M * n_pad) if apply_sine else 0,
        bytes_accessed=(M * dim_in * x_isz + dim_in * n_pad * w_isz
                        + 2 * n_pad * 4 + M * n_pad * o_isz),
    )

    def build(buffered):
        w_kwargs = dict(pipeline_mode=pl.Buffered(1)) if buffered else {}
        in_specs = [
            pl.BlockSpec((tm, dim_in), lambda i, j: (i, 0)),
            pl.BlockSpec((dim_in, tn), lambda i, j: (0, j), **w_kwargs),
            pl.BlockSpec((2, tn), lambda i, j: (0, j), **w_kwargs),
        ]
        return pl.pallas_call(
            kernel,
            out_shape=jax.ShapeDtypeStruct((M, n_pad), out_dtype),
            grid_spec=pltpu.PrefetchScalarGridSpec(
                num_scalar_prefetch=0,
                grid=(n_row_blocks, n_col_blocks),
                in_specs=in_specs,
                out_specs=pl.BlockSpec((tm, tn), lambda i, j: (i, j)),
            ),
            compiler_params=pltpu.CompilerParams(
                # Row axis "parallel" -> sharded across v7x's two TensorCores
                # (no-op on single-TC v5e/v6e).
                dimension_semantics=("parallel", "arbitrary"),
                vmem_limit_bytes=limit,
            ),
            cost_estimate=cost,
        )

    try:
        out2d = build(use_buffered)(x2d, wT, mods)
    except Exception:
        if not use_buffered:
            raise
        # pipeline_mode=Buffered(1) unsupported on this jax build; retry with
        # default double-buffered resident operands.
        out2d = build(False)(x2d, wT, mods)

    if n_pad != dim_out:
        out2d = out2d[:, :dim_out]
    return out2d.reshape(orig_shape[:-1] + (dim_out,))


# ---------------------------------------------------------------------------
# Functional API (packs per call; prefer the class for repeated forwards)
# ---------------------------------------------------------------------------
def modulated_siren_layer(x, weight, bias, scale=None, shift=None, *, w0=1.0,
                          is_last=False, apply_activation=True,
                          precision=None, tm=None, tn=None):
    wT, mods, apply_sine, dim_out = prepare_siren_params(
        weight, bias, scale, shift, w0=w0, is_last=is_last,
        apply_activation=apply_activation)
    return siren_fused_forward(x, wT, mods, apply_sine=apply_sine,
                               dim_out=dim_out, precision=precision,
                               tm=tm, tn=tn)


# ---------------------------------------------------------------------------
# Module-style container mirroring the PyTorch __init__ (forward only)
# ---------------------------------------------------------------------------
class ModulatedSirenLayer:
    """JAX/Pallas port of the PyTorch ModulatedSirenLayer.

    W^T and the folded [scale'; shift'] vectors are packed once at __init__,
    so each forward is a single fused pallas_call (no per-call transpose or
    stack ops round-tripping the weight through HBM). Keep x and the layer
    dtype bf16 end-to-end if the surrounding model allows it (f32
    accumulation and the f32 epilogue are preserved inside the kernel).
    For strict f32 matmul parity with PyTorch pass
    precision=jax.lax.Precision.HIGHEST.
    """

    def __init__(self, key, dim_in, dim_out, w0=1.0, is_first=False,
                 is_last=False, modulate_shift=True, modulate_scale=True,
                 apply_activation=True, dtype=jnp.float32, precision=None):
        self.dim_in = dim_in
        self.dim_out = dim_out
        self.w0 = float(w0)
        self.is_first = is_first
        self.is_last = is_last
        self.modulate_scale = modulate_scale
        self.modulate_shift = modulate_shift
        self.apply_activation = apply_activation
        self.precision = precision
        init_range = (1.0 / dim_in) if is_first else math.sqrt(6.0 / dim_in) / w0
        # torch: weight.uniform_(-r, r), bias zeros (same distribution, JAX RNG).
        self.weight = jax.random.uniform(
            key, (dim_out, dim_in), dtype, -init_range, init_range)
        self.bias = jnp.zeros((dim_out,), dtype)
        # FiLM identity init. NOTE: as in the PyTorch reference, FiLM is built
        # with dim_in but applied to the (dim_out)-wide linear output, so the
        # modulated path requires dim_in == dim_out (checked at pack time).
        self.scale = jnp.ones((dim_in,), dtype) if modulate_scale else None
        self.shift = jnp.zeros((dim_in,), dtype) if modulate_shift else None
        self._repack()

    def _repack(self):
        """Re-fold W^T / mods (call again after mutating parameters)."""
        self._wT, self._mods, self._apply_sine, _ = prepare_siren_params(
            self.weight, self.bias, self.scale, self.shift, w0=self.w0,
            is_last=self.is_last, apply_activation=self.apply_activation)

    def __call__(self, x):
        return siren_fused_forward(
            x, self._wT, self._mods, apply_sine=self._apply_sine,
            dim_out=self.dim_out, precision=self.precision)


# ---------------------------------------------------------------------------
# Deterministic smoke test
# ---------------------------------------------------------------------------
if __name__ == "__main__":
    key = jax.random.PRNGKey(0)
    batch, seq, dim_in, dim_out = 2, 8, 32, 32
    w0 = 1.0
    kx, kw, ks, kb, kw2, kw3, kw4 = jax.random.split(key, 7)

    x = jax.random.normal(kx, (batch, seq, dim_in), dtype=jnp.float32)

    # 1) Standard modulated layer (identity FiLM init) + sine activation.
    layer = ModulatedSirenLayer(kw, dim_in, dim_out, w0=w0,
                                modulate_scale=True, modulate_shift=True,
                                apply_activation=True)
    out = jax.block_until_ready(layer(x))
    y_ref = x @ layer.weight.T + layer.bias
    y_ref = layer.scale[None, None, :] * y_ref + layer.shift[None, None, :]
    ref = jnp.sin(w0 * y_ref)
    assert out.shape == (batch, seq, dim_out) and out.dtype == x.dtype
    assert jnp.allclose(out, ref, atol=3e-2, rtol=3e-2)

    # 2) Non-identity scale/shift through the functional API.
    scale = 1.0 + 0.1 * jax.random.normal(ks, (dim_out,), jnp.float32)
    shift = 0.1 * jax.random.normal(kb, (dim_out,), jnp.float32)
    out2 = jax.block_until_ready(
        modulated_siren_layer(x, layer.weight, layer.bias, scale, shift, w0=w0))
    y2 = x @ layer.weight.T + layer.bias
    ref2 = jnp.sin(w0 * (scale[None, None, :] * y2 + shift[None, None, :]))
    assert jnp.allclose(out2, ref2, atol=3e-2, rtol=3e-2)

    # 3) is_last RGB head (dim_out=3): linear + 0.5, lane-padded output path.
    last_layer = ModulatedSirenLayer(kw2, dim_in, 3, w0=w0, is_last=True)
    out3 = jax.block_until_ready(last_layer(x))
    ref3 = x @ last_layer.weight.T + last_layer.bias + 0.5
    assert out3.shape == (batch, seq, 3)
    assert jnp.allclose(out3, ref3, atol=3e-2, rtol=3e-2)

    # 4) Tiny-K first layer (2 coordinate inputs): VPU outer-product path.
    w_first = jax.random.uniform(kw3, (dim_out, 2), jnp.float32, -0.5, 0.5)
    b_first = 0.01 * jax.random.normal(kw4, (dim_out,), jnp.float32)
    x_first = jax.random.normal(kx, (batch, seq, 2), dtype=jnp.float32)
    out4 = jax.block_until_ready(
        modulated_siren_layer(x_first, w_first, b_first, w0=30.0,
                              apply_activation=True))
    ref4 = jnp.sin(30.0 * (x_first @ w_first.T + b_first))
    assert out4.shape == (batch, seq, dim_out)
    assert jnp.allclose(out4, ref4, atol=1e-4, rtol=1e-4)

    # 5) Wide layer with a forced feature-axis (tn) split.
    wide = 256
    w_wide = jax.random.uniform(kw3, (wide, dim_in), jnp.float32, -0.4, 0.4)
    b_wide = 0.01 * jax.random.normal(kw4, (wide,), jnp.float32)
    s_wide = 1.0 + 0.1 * jax.random.normal(ks, (wide,), jnp.float32)
    t_wide = 0.1 * jax.random.normal(kb, (wide,), jnp.float32)
    out5 = jax.block_until_ready(
        modulated_siren_layer(x, w_wide, b_wide, s_wide, t_wide, w0=w0, tn=128))
    y5 = x @ w_wide.T + b_wide
    ref5 = jnp.sin(w0 * (s_wide[None, None, :] * y5 + t_wide[None, None, :]))
    assert out5.shape == (batch, seq, wide)
    assert jnp.allclose(out5, ref5, atol=3e-2, rtol=3e-2)

    print("KERNEL_OK")
</pallas_src>

<mosaic_0001>
module attributes {stable_mosaic.version = 11 : i64} {
  func.func @_msl_kernel(%arg0: i32, %arg1: i32, %arg2: memref<8x32xf32, #tpu.memory_space<vmem>>, %arg3: memref<32x128xf32, #tpu.memory_space<vmem>>, %arg4: memref<2x128xf32, #tpu.memory_space<vmem>>, %arg5: memref<8x128xf32, #tpu.memory_space<vmem>>) attributes {dimension_semantics = [#tpu.dimension_semantics<parallel>, #tpu.dimension_semantics<arbitrary>], iteration_bounds = array<i64: 2, 1>, scalar_prefetch = 0 : i64, scratch_operands = 0 : i64, tpu.core_type = #tpu.core_type<tc>, window_params = [{transform_indices = @transform_0, window_bounds = array<i64: 8, 32>}, {transform_indices = @transform_1, window_bounds = array<i64: 32, 128>}, {transform_indices = @transform_2, window_bounds = array<i64: 2, 128>}, {transform_indices = @transform_3, window_bounds = array<i64: 8, 128>}]} {
    %c0 = arith.constant 0 : index
    %c0_0 = arith.constant 0 : index
    %0 = vector.load %arg2[%c0, %c0_0] : memref<8x32xf32, #tpu.memory_space<vmem>>, vector<8x32xf32>
    %c0_1 = arith.constant 0 : index
    %c0_2 = arith.constant 0 : index
    %1 = vector.load %arg3[%c0_1, %c0_2] : memref<32x128xf32, #tpu.memory_space<vmem>>, vector<32x128xf32>
    %cst = arith.constant dense<0.000000e+00> : vector<8x128xf32>
    %2 = tpu.matmul %0, %1, %cst {dimension_numbers = #tpu.dot_dimension_numbers<[1], [0], [0], [1], [0, 0, 1, 1], [], []>} : vector<8x32xf32>, vector<32x128xf32>, vector<8x128xf32> -> vector<8x128xf32>
    %c0_3 = arith.constant 0 : index
    %c0_4 = arith.constant 0 : index
    %3 = vector.load %arg4[%c0_3, %c0_4] : memref<2x128xf32, #tpu.memory_space<vmem>>, vector<2x128xf32>
    %4 = vector.extract_strided_slice %3 {offsets = [0, 0], sizes = [1, 128], strides = [1, 1]} : vector<2x128xf32> to vector<1x128xf32>
    %5 = vector.broadcast %4 : vector<1x128xf32> to vector<8x128xf32>
    %6 = arith.mulf %5, %2 : vector<8x128xf32>
    %7 = vector.extract_strided_slice %3 {offsets = [1, 0], sizes = [1, 128], strides = [1, 1]} : vector<2x128xf32> to vector<1x128xf32>
    %8 = vector.broadcast %7 : vector<1x128xf32> to vector<8x128xf32>
    %9 = arith.addf %6, %8 : vector<8x128xf32>
    %10 = math.sin %9 : vector<8x128xf32>
    %c0_5 = arith.constant 0 : index
    %c0_6 = arith.constant 0 : index
    %11 = vector.load %arg5[%c0_5, %c0_6] : memref<8x128xf32, #tpu.memory_space<vmem>>, vector<8x128xf32>
    tpu.vector_store %arg5[%c0_5, %c0_6], %10 {strides = array<i32>} : memref<8x128xf32, #tpu.memory_space<vmem>>, vector<8x128xf32>,
    return
  }
  func.func @transform_0(%arg0: i32, %arg1: i32) -> (i32, i32) {
    %c0_i32 = arith.constant 0 : i32
    %c0_i32_0 = arith.constant 0 : i32
    return %arg0, %c0_i32 : i32, i32
  }
  func.func @transform_1(%arg0: i32, %arg1: i32) -> (i32, i32) {
    %c0_i32 = arith.constant 0 : i32
    %c0_i32_0 = arith.constant 0 : i32
    return %c0_i32, %arg1 : i32, i32
  }
  func.func @transform_2(%arg0: i32, %arg1: i32) -> (i32, i32) {
    %c0_i32 = arith.constant 0 : i32
    %c0_i32_0 = arith.constant 0 : i32
    return %c0_i32, %arg1 : i32, i32
  }
  func.func @transform_3(%arg0: i32, %arg1: i32) -> (i32, i32) {
    %c0_i32 = arith.constant 0 : i32
    return %arg0, %arg1 : i32, i32
  }
}

</mosaic_0001>

<bundles_post_ra>
// kernel: tpu_custom_call.1
= control target key start
LH: loop header
LB: loop body
LE: loop exit
PB: predicated region body
PF: predicated region fallthrough
CT: control target
= control target key end

     0   :  { %8 = vsyncpa [#allocation3], 0  ;;  %s1183_s0 = inlined_call_operand.hbm [shape: f32[16,32], index: 0, kind: input, shape index: {}]   ;;  %s1184_s1 = inlined_call_operand.hbm [shape: f32[32,128], index: 1, kind: input, shape index: {}]   ;;  %s1185_s2 = inlined_call_operand.hbm [shape: f32[2,128], index: 2, kind: input, shape index: {}]   ;;  %s1186_s3 = inlined_call_operand.hbm [shape: f32[16,128], index: 3, kind: output, shape index: {}]  }
   0x1   :  { %10 = vsyncpa [#allocation3 + $0x1], 0 }
   0x2   :  { %11 = vsyncpa [#allocation6], 0 }
   0x3   :  { %12 = vsyncpa [#allocation4], 0 }
   0x4   :  { %14 = vsyncpa [#allocation4 + $0x1], 0  ;;  %s908_s12 = smov 0   ;;  %s910_s13 = smov 0  }
   0x5   :  { %s912_s14 = smov 0   ;;  %s914_s15 = smov 0  }
   0x6   :  { %s916_s16 = smov 0   ;;  %s918_s17 = smov 0  }
   0x7 LB: > { %s553_s18 = sadd.s32 4294967295, %s871_s17   ;;  %s554_s19 = sadd.s32 4294967294, %s871_s17   ;;  %s871_s17 = sphi %s918_s17, %s20_s17   ;;  %s867_s16 = sphi %s916_s16, %s1208_s16   ;;  %s863_s15 = sphi %s914_s15, %s1207_s15   ;;  %s859_s14 = sphi %s912_s14, %s1206_s14   ;;  %s855_s13 = sphi %s910_s13, %s1205_s13   ;;  %s851_s12 = sphi %s908_s12, %s1204_s12  }
   0x8   : > { %p52_p0 = scmp.ne.s32.totalorder %s855_s13, %s851_s12  ;;  %p942_p1 = scmp.eq.s32.totalorder %s553_s18, 0 }
   0x9   : > { %p946_p2 = scmp.eq.s32.totalorder %s553_s18, 1  ;;  %p136_p3 = scmp.eq.s32.totalorder %s554_s19, 1 }
   0xa   : > { %s1191_s20 = scalar_select %p942_p1, 1, 0 }
   0xb   : > { %p952_p4 = por %p942_p1, %p52_p0  ;;  %p555_p5 = scmp.ge.s32.totalorder %s871_s17, 1 }
   0xc   : > { %p957_p6 = por %p136_p3, %p52_p0  ;;  %p143_p7 = scmp.lt.s32.totalorder %s871_s17, 3 }
   0xd   : > { %s1193_s22 = scalar_select %p952_p4, 1, 0 }
   0xe   : > { %s1194_s23 = scalar_select %p957_p6, 1, 0 }
   0xf   : > { %p962_p8 = pnand %p555_p5, %p143_p7  ;;  %s873_s25 = smov [#allocation5]  }
  0x10   : > { %s157_s26 = sshll.u32 %s873_s25, 4  ;;  %s874_s28 = smov [#allocation7]   ;;  %s966_s26 = int_to_ptr.vmem [resolvable:$true] %s157_s26 }
  0x11   : > { %p613_p9 = pneg %p962_p8  ;;  %s173_s29 = sshll.u32 %s874_s28, 4  ;;  %s977_s29 = int_to_ptr.vmem [resolvable:$true] %s173_s29 }
  0x12   : > { %s699_s5 = scalar_lea.hbm %s1184_s1, 512 }
  0x13   : > { %p973_p11 = pnand %p613_p9, %p942_p1  ;;  %p700_p12 = scmp.ne.s32.totalorder %s1184_s1, %s699_s5 }
  0x14   : > { %p706_p5 = scmp.lt.u32.totalorder %s699_s5, %s1184_s1 }
  0x15   : > { %p701_p13 = pneg %p973_p11 }
  0x17   : > { %p702_p0 = pnand %p701_p13, %p700_p12 }
  0x19   : > { %p703_p3 = pneg %p702_p0 }
  0x1b   : > { %p708_p7 = pnand %p706_p5, %p703_p3 }
  0x1d   : > { %711 = shalt.err (!%p708_p7)
}
  0x1e   : > { %s712_s10 = scalar_lea.vmem %s966_s26, 512  ;;  %p720_p1 = scmp.lt.s32.totalorder %s966_s26, %s966_s26 }
  0x1f   : > { %p713_p9 = scmp.ne.s32.totalorder %s966_s26, %s712_s10  ;;  %p721_p12 = scmp.lt.s32.totalorder %s712_s10, %s712_s10 }
  0x21   : > { %p715_p10 = pnand %p713_p9, %p701_p13  ;;  %p722_p0 = por %p721_p12, %p720_p1 }
  0x23   : > { %p716_p6 = pneg %p715_p10 }
  0x25   : > { %p723_p4 = pnand %p722_p0, %p716_p6 }
  0x27   : > { %726 = shalt.err (!%p723_p4)
}
  0x28   : > { %s875_s11 = smov 128   ;;  %s876_s18 = smov 8  }
  0x29   : > { %616 = dma.hbm_to_vmem [thread:$0]  (!%p973_p11), %s1184_s1, 512, %s966_s26, [#allocation6], %s875_s11, %s875_s11, %s876_s18  }
  0x2a   : > { %s727_s4 = scalar_lea.hbm %s1185_s2, 32 }
  0x2b   : > { %p728_p1 = scmp.ne.s32.totalorder %s1185_s2, %s727_s4  ;;  %p734_p10 = scmp.lt.u32.totalorder %s727_s4, %s1185_s2 }
  0x2d   : > { %p730_p4 = pnand %p728_p1, %p701_p13 }
  0x2f   : > { %p731_p6 = pneg %p730_p4 }
  0x31   : > { %p736_p3 = pnand %p734_p10, %p731_p6 }
  0x33   : > { %739 = shalt.err (!%p736_p3)
}
  0x34   : > { %s740_s26 = scalar_lea.vmem %s977_s29, 32  ;;  %p748_p12 = scmp.lt.s32.totalorder %s977_s29, %s977_s29 }
  0x35   : > { %p741_p5 = scmp.ne.s32.totalorder %s977_s29, %s740_s26  ;;  %p749_p0 = scmp.lt.s32.totalorder %s740_s26, %s740_s26 }
  0x37   : > { %p743_p7 = pnand %p741_p5, %p701_p13  ;;  %p750_p1 = por %p749_p0, %p748_p12 }
  0x39   : > { %p744_p9 = pneg %p743_p7 }
  0x3b   : > { %p751_p4 = pnand %p750_p1, %p744_p9 }
  0x3d   : > { %754 = shalt.err (!%p751_p4)
}
  0x3e   : > { %619 = dma.hbm_to_vmem [thread:$0]  (!%p973_p11), %s1185_s2, 32, %s977_s29, [#allocation6]  }
  0x3f   : > { %s32_s11 = sadd.s32 1, %s867_s16  ;;  %s39_s18 = sadd.s32 1, %s859_s14 }
  0x40   : > { %p34_p13 = scmp.ge.s32.totalorder %s32_s11, 2  ;;  %p46_p6 = scmp.ne.s32.totalorder %s859_s14, %s855_s13 }
  0x41   : > { %p47_p10 = scmp.eq.s32.totalorder %s871_s17, 0  ;;  %p630_p3 = scmp.lt.s32.totalorder %s871_s17, 2 }
  0x42   : > { %s1210_s11 = smov (%p34_p13, %s32_s11), 0  ;;  %p1041_p7 = por %p946_p2, %p46_p6 }
  0x43   : > { %p48_p5 = por %p47_p10, %p46_p6  ;;  %s36_s19 = ssub.s32 %s867_s16, %s1210_s11 }
  0x44   : > { %s1197_s27 = scalar_select %p1041_p7, 1, 0 }
  0x45   : > { %s184_s25 = sand.u32 1, %s859_s14   ;;  %p37_p9 = scmp.eq.s32.totalorder %s36_s19, 0 }
  0x46   : > { %s559_s29 = sshll.u32 %s184_s25, 3  ;;  %s560_s28 = sshll.u32 %s867_s16, 7 }
  0x47   : > { %s1050_s30 = scalar_select %p37_p9, %s859_s14, %s39_s18  }
  0x48   : > { %s1055_s6 = scalar_lea.hbm %s1183_s0, %s560_s28  ;;  %s188_s21 = scalar_lea.vmem [#allocation2], %s559_s29 }
  0x49   : > { %s195_s7 = sshll.u32 %s188_s21, 4  ;;  %p1059_p2 = pnand %p630_p3, %p48_p5  ;;  %s1063_s7 = int_to_ptr.vmem [resolvable:$true] %s195_s7 }
  0x4a   : > { %s185_s26 = scalar_lea.sflag [#allocation3], %s184_s25  ;;  %s755_s9 = scalar_lea.hbm %s1055_s6, 128 }
  0x4b   : > { %p756_p11 = scmp.ne.s32.totalorder %s1055_s6, %s755_s9  ;;  %p757_p12 = pneg %p1059_p2 }
  0x4c   : > { %s760_s19 = scalar_lea.hbm %s1183_s0, 256  ;;  %p761_p4 = scmp.lt.u32.totalorder %s1055_s6, %s1183_s0 }
  0x4d   : > { %p758_p0 = pnand %p757_p12, %p756_p11  ;;  %p762_p13 = scmp.lt.u32.totalorder %s760_s19, %s755_s9 }
  0x4e   : > { %p764_p10 = scmp.lt.u32.totalorder %s755_s9, %s1055_s6 }
  0x4f   : > { %p759_p1 = pneg %p758_p0  ;;  %p763_p6 = por %p762_p13, %p761_p4 }
  0x51   : > { %p765_p3 = por %p764_p10, %p763_p6 }
  0x53   : > { %p766_p5 = pnand %p765_p3, %p759_p1 }
  0x55   : > { %769 = shalt.err (!%p766_p5)
}
  0x56   : > { %s770_s25 = scalar_lea.vmem %s1063_s7, 128  ;;  %s877_s4 = smov [#allocation2]  }
  0x57   : > { %p771_p9 = scmp.ne.s32.totalorder %s1063_s7, %s770_s25  ;;  %s775_s5 = sshll.u32 %s877_s4, 4  ;;  %s776_s5 = int_to_ptr.vmem [resolvable:$false] %s775_s5 }
  0x58   : > { %s777_s21 = scalar_lea.vmem %s776_s5, 256  ;;  %p778_p7 = scmp.lt.s32.totalorder %s1063_s7, %s776_s5 }
  0x59   : > { %p773_p11 = pnand %p771_p9, %p757_p12  ;;  %p779_p4 = scmp.lt.s32.totalorder %s777_s21, %s770_s25 }
  0x5b   : > { %p774_p0 = pneg %p773_p11  ;;  %p780_p13 = por %p779_p4, %p778_p7 }
  0x5d   : > { %p781_p6 = pnand %p780_p13, %p774_p0 }
  0x5f   : > { %784 = shalt.err (!%p781_p6)
}
  0x60   : > { %623 = dma.hbm_to_vmem [thread:$0]  (!%p1059_p2), %s1055_s6, 128, %s1063_s7, %s185_s26  }
  0x61   : > { %204 = sbr.rel (%p962_p8) target bundleno = 428 (0x1ac), region = 32  ;;  %s1093_s9 = sand.u32 (!%p962_p8), 1, %s855_s13  }
  0x62   : > { %s562_s10 = sshll.u32 (!%p962_p8), %s1093_s9, 3  ;;  %s207_s18 = scalar_lea.sflag (!%p962_p8), [#allocation3], %s1093_s9 }
  0x63   : > { %s210_s19 = scalar_lea.vmem (!%p962_p8), [#allocation2], %s562_s10  ;;  %p1199_p7 = scmp.ne.s32.totalorder (!%p962_p8), %s1193_s22, 0 }
  0x68   : > { %838 = dma.done.wait (%p1199_p7), %s207_s18, 128  }
  0x69   : > { %840 = vsyncadd (%p1199_p7), %s207_s18, 4294967168  ;;  %p1200_p2 = scmp.ne.s32.totalorder %s1191_s20, 0 }
  0x6b   : > { %842 = dma.done.wait (%p1200_p2), [#allocation6], 544  }
  0x6c   : > { %844 = vsyncadd (%p1200_p2), [#allocation6], 4294966752  ;;  %v878_v0 = vmov 0.0|0.0   ;;  %vm879_vm0 = vmmov 0   ;;  %v880_v1 = vmov 0.0   ;;  %v242_v2 = vld [vmem:[#allocation5] sm:$0xff]  ;;  %v321_v9 = vlaneseq }
  0x6d   : > { %591 = vmatprep.subr.bf16.mxu0 %v878_v0  ;;  %588 = vmatprep.mubr.msk.f32.mxu0 %vm879_vm0, %v880_v1  ;;  %v243_v3 = vld [vmem:[#allocation5 + $0x8] sm:$0xff]  ;;  %v244_v4 = vld [vmem:[#allocation5 + $0x10] sm:$0xff]  ;;  %v245_v6 = vld [vmem:[#allocation5 + $0x18] sm:$0xff]  ;;  %vm246_vm1 = vcmask 261120   ;;  %v881_v30 = vmov 683565275  }
  0x6e   : > { %v592_v5 = vpack.c.bf16 %v243_v3, %v242_v2  ;;  %v595_v7 = vpack.c.bf16 %v245_v6, %v244_v4  ;;  %v241_v8 = vld [vmem:[%s210_s19] sm:$0xff]  ;;  %v322_v10 = vshrl.u32 %v321_v9, 7  ;;  %v320_v12 = vld [vmem:[#allocation7] sm:$0x3]  ;;  %v882_v32 = vmov 2475754826  }
  0x6f   : > { %v883_v35 = vmov 2131351028   ;;  %v884_v38 = vmov 2102212464   ;;  %v885_v41 = vmov 920167782  }
  0x70   : > { %593 = vmatpush3.bf16.msra.mxu0 %v592_v5  ;;  %v323_v11 = vsub.s32 0, %v322_v10  ;;  %v328_v13 = vsub.s32 1, %v322_v10  ;;  %v886_v44 = vmov 1326507024   ;;  %s572_s20 = sshll.u32 %s863_s15, 7  ;;  %s240_s22 = scalar_lea.vmem [#allocation8], %s562_s10 }
  0x71   : > { %594 = vmatprep.subr.bf16.mxu0 %v878_v0  ;;  %s451_s24 = sshll.u32 %s240_s22, 4  ;;  %s1134_s8 = scalar_lea.hbm %s1186_s3, %s572_s20  ;;  %s1136_s24 = int_to_ptr.vmem [resolvable:$true] %s451_s24 }
  0x72   : > { %v324_v14 = vrot.slane %v320_v12, %v323_v11  ;;  %v329_v15 = vrot.slane %v320_v12, %v328_v13  ;;  %s437_s15 = scalar_lea.sflag [#allocation4], %s1093_s9  ;;  %s785_s26 = scalar_lea.vmem %s1136_s24, 128 }
  0x73   : > { %p786_p8 = scmp.ne.s32.totalorder %s1136_s24, %s785_s26  ;;  %p1201_p12 = scmp.ne.s32.totalorder %s1197_s27, 0 }
  0x74   : > { %596 = vmatpush3.bf16.msra.mxu0 %v595_v7  ;;  %s887_s29 = smov [#allocation8]  }
  0x75   : > { %p787_p1 = pnand %p786_p8, %p1201_p12  ;;  %s789_s28 = sshll.u32 %s887_s29, 4  ;;  %s790_s28 = int_to_ptr.vmem [resolvable:$false] %s789_s28 }
  0x76   : > { %s791_s25 = scalar_lea.vmem %s790_s28, 256  ;;  %p792_p3 = scmp.lt.s32.totalorder %s1136_s24, %s790_s28 }
  0x77   : > { %589 = vmatmul.mubr.msk.f32.vlgmr.msra.gmra.mrb[0].mxu0 %vm246_vm1, %v241_v8  ;;  %p788_p10 = pneg %p787_p1  ;;  %p793_p5 = scmp.lt.s32.totalorder %s791_s25, %s785_s26 }
  0x79   : > { %p794_p9 = por %p793_p5, %p792_p3 }
  0x7b   : > { %p795_p11 = pnand %p794_p9, %p788_p10 }
 0x14a   : > { %v316_v16 = vpop.f32.mrb[0].mxu0 }
 0x14b   : > { %v325_v17 = vmul.f32 %v324_v14, %v316_v16  ;;  %v590_v18 = vpop.f32.mrb[1].mxu0 }
 0x14d   : > { %v1107_v19 = vadd.f32 %v329_v15, %v325_v17 }
 0x14f   : > { %v334_v20 = vand.u32 2139095040, %v1107_v19  ;;  %v331_v24 = vand.u32 2147483647, %v1107_v19  ;;  %vm333_vm9 = vcmp.lt.s32.totalorder %v1107_v19, 0  ;;  %vm423_vm14 = vweird.f32 %v1107_v19 }
 0x151   : > { %v335_v21 = vshrl.u32 %v334_v20, 23  ;;  %v338_v27 = vand.u32 8388607, %v331_v24  ;;  %vm332_vm10 = vcmp.le.f32.partialorder %v331_v24, 0.7853982 }
 0x153   : > { %v567_v22 = vadd.s32 4294967169, %v335_v21  ;;  %v339_v46 = vor.u32 8388608, %v338_v27 }
 0x155   : > { %v341_v23 = vadd.s32 1, %v567_v22  ;;  %v379_v60 = vshll.u32 %v339_v46, 8 }
 0x157   : > { %vm342_vm2 = vcmp.gt.s32.totalorder %v341_v23, 0 }
 0x158   : > { %v343_v25 = vsel %vm342_vm2, %v341_v23, 0 }
 0x159   : > { %v345_v26 = vand.u32 31, %v343_v25  ;;  %v344_v29 = vshrl.u32 %v343_v25, 5 }
 0x15b   : > { %v346_v28 = vsub.s32 32, %v345_v26  ;;  %v348_v31 = vshll.u32 %v881_v30, %v345_v26  ;;  %v351_v33 = vshll.u32 %v882_v32, %v345_v26  ;;  %v354_v37 = vshll.u32 %v883_v35, %v345_v26 }
 0x15c   : > { %v357_v40 = vshll.u32 %v884_v38, %v345_v26  ;;  %v360_v43 = vshll.u32 %v885_v41, %v345_v26  ;;  %vm363_vm3 = vcmp.lt.s32.totalorder %v344_v29, 1  ;;  %vm366_vm4 = vcmp.lt.s32.totalorder %v344_v29, 4 }
 0x15d   : > { %v349_v34 = vshrl.u32 %v882_v32, %v346_v28  ;;  %v352_v36 = vshrl.u32 %v883_v35, %v346_v28  ;;  %v355_v39 = vshrl.u32 %v884_v38, %v346_v28  ;;  %v358_v42 = vshrl.u32 %v885_v41, %v346_v28 }
 0x15e   : > { %v361_v45 = vshrl.u32 %v886_v44, %v346_v28  ;;  %v347_v55 = vshrl.u32 %v881_v30, %v346_v28  ;;  %vm365_vm5 = vcmp.lt.s32.totalorder %v344_v29, 3  ;;  %vm364_vm6 = vcmp.lt.s32.totalorder %v344_v29, 2 }
 0x15f   : > { %v350_v47 = vor.u32 %v349_v34, %v348_v31  ;;  %v353_v48 = vor.u32 %v352_v36, %v351_v33  ;;  %v356_v49 = vor.u32 %v355_v39, %v354_v37  ;;  %v359_v50 = vor.u32 %v358_v42, %v357_v40 }
 0x160   : > { %v362_v51 = vor.u32 %v361_v45, %v360_v43 }
 0x161   : > { %v368_v52 = vsel %vm366_vm4, %v356_v49, 2102212464  ;;  %v371_v53 = vsel %vm363_vm3, %v350_v47, %v353_v48  ;;  %v375_v54 = vsel %vm363_vm3, %v353_v48, %v356_v49  ;;  %v372_v56 = vsel %vm366_vm4, %v359_v50, 920167782 }
 0x162   : > { %v376_v57 = vsel %vm366_vm4, %v362_v51, 1326507024  ;;  %v373_v58 = vsel %vm365_vm5, %v356_v49, %v372_v56  ;;  %v367_v61 = vsel %vm363_vm3, %v347_v55, %v350_v47  ;;  %v369_v62 = vsel %vm365_vm5, %v353_v48, %v368_v52 }
 0x163   : > { %v377_v59 = vsel %vm365_vm5, %v359_v50, %v376_v57  ;;  %v374_v63 = vsel %vm364_vm6, %v371_v53, %v373_v58  ;;  %v370_v5 = vsel %vm364_vm6, %v367_v61, %v369_v62 }
 0x164   : > { %v378_v0 = vsel %vm364_vm6, %v375_v54, %v377_v59  ;;  %v1116_v3 = vmul.u32.u64.low %v379_v60, %v374_v63  ;;  %v1117_v4 = vmul.u32.u64.high %v379_v60, %v374_v63, %v1116_v3  ;;  %v386_v7 = vmul.u32 %v379_v60, %v370_v5 }
 0x165   : > { %v1113_v1 = vmul.u32.u64.low %v379_v60, %v378_v0  ;;  %v1114_v2 = vmul.u32.u64.high %v379_v60, %v378_v0, %v1113_v1 }
 0x166   : > { %v389_v6 = vadd.s32 1, %v1117_v4 }
 0x167   : > { %vm388_vm7 = vc.u32 %v1114_v2, %v1116_v3  ;;  %v387_v20 = vadd.s32 %v1116_v3, %v1114_v2 }
 0x168   : > { %v390_v8 = vsel %vm388_vm7, %v389_v6, %v1117_v4 }
 0x169   : > { %v391_v9 = vadd.s32 %v390_v8, %v386_v7 }
 0x16b   : > { %v392_v10 = vadd.s32 536870912, %v391_v9 }
 0x16d   : > { %v393_v11 = vshrl.u32 %v392_v10, 30 }
 0x16f   : > { %v394_v12 = vshll.u32 %v393_v11, 30  ;;  %v417_v33 = vsub.s32 4, %v393_v11 }
 0x171   : > { %v395_v13 = vsub.s32 %v391_v9, %v394_v12  ;;  %v418_v36 = vsel %vm333_vm9, %v417_v33, %v393_v11 }
 0x172   : > { %v420_v38 = vsel %vm332_vm10, 0, %v418_v36 }
 0x173   : > { %v397_v14 = vsub.s32 0, %v395_v13  ;;  %v424_v39 = vadd.s32 3, %v420_v38 }
 0x175   : > { %v568_v15 = vmin.u32 %v397_v14, %v395_v13  ;;  %v425_v40 = vand.u32 3, %v424_v39 }
 0x177   : > { %v399_v16 = vclz %v568_v15  ;;  %vm430_vm11 = vcmp.eq.s32.totalorder %v425_v40, 2  ;;  %vm427_vm12 = vcmp.eq.s32.totalorder %v425_v40, 0  ;;  %vm426_vm13 = vcmp.lt.s32.totalorder %v425_v40, 2 }
 0x179   : > { %v569_v17 = vadd.s32 4294967294, %v399_v16 }
 0x17b   : > { %vm570_vm8 = vcmp.lt.s32.totalorder %v569_v17, 0 }
 0x17c   : > { %v402_v18 = vsel %vm570_vm8, 0, %v569_v17 }
 0x17d   : > { %v403_v21 = vsub.s32 32, %v402_v18  ;;  %v407_v22 = vsub.s32 4294967266, %v402_v18  ;;  %v404_v23 = vshll.u32 %v395_v13, %v402_v18 }
 0x17f   : > { %v405_v25 = vshrl.u32 %v387_v20, %v403_v21  ;;  %v408_v26 = vadd.s32 127, %v407_v22 }
 0x181   : > { %v406_v27 = vor.u32 %v405_v25, %v404_v23  ;;  %v409_v28 = vshll.u32 %v408_v26, 23 }
 0x183   : > { %v410_v29 = vor.u32 4788187, %v409_v28  ;;  %v413_v31 = vcvt.s32.f32 %v406_v27 }
 0x185   : > { %v411_v30 = vand.u32 2147483647, %v410_v29 }
 0x187   : > { %v414_v32 = vmul.f32 %v413_v31, %v411_v30 }
 0x189   : > { %v415_v34 = vxor.u32 2147483648, %v414_v32 }
 0x18b   : > { %v416_v35 = vsel %vm333_vm9, %v415_v34, %v414_v32 }
 0x18c   : > { %v419_v37 = vsel %vm332_vm10, %v1107_v19, %v416_v35 }
 0x18d   : > { %695 = vcosq.f32 %v419_v37 }
 0x18e   : > { %697 = vsinq.f32 %v419_v37 }
 0x197   : > { %v696_v41 = vpop.eup %695 }
 0x198   : > { %v698_v42 = vpop.eup %697  ;;  %v431_v43 = vxor.u32 2147483648, %v696_v41 }
 0x199   : > { %v428_v44 = vxor.u32 2147483648, %v698_v42 }
 0x19a   : > { %v432_v24 = vsel %vm430_vm11, %v431_v43, %v698_v42 }
 0x19b   : > { %v429_v45 = vsel %vm427_vm12, %v696_v41, %v428_v44 }
 0x19c   : > { %v433_v46 = vsel %vm426_vm13, %v429_v45, %v432_v24 }
 0x19d   : > { %v434_v47 = vsel %vm423_vm14, nan, %v433_v46 }
 0x19e   : > { %435 = vst [vmem:[%s240_s22] sm:$0xff] %v434_v47 }
 0x19f   : > { %798 = shalt.err (!%p795_p11)
}
 0x1a0   : > { %s799_s4 = scalar_lea.hbm %s1134_s8, 128  ;;  %s803_s9 = scalar_lea.hbm %s1186_s3, 256 }
 0x1a1   : > { %p800_p0 = scmp.ne.s32.totalorder %s1134_s8, %s799_s4  ;;  %p804_p6 = scmp.lt.u32.totalorder %s1134_s8, %s1186_s3 }
 0x1a2   : > { %p805_p7 = scmp.lt.u32.totalorder %s803_s9, %s799_s4  ;;  %p807_p8 = scmp.lt.u32.totalorder %s799_s4, %s1134_s8 }
 0x1a3   : > { %p801_p4 = pnand %p800_p0, %p1201_p12 }
 0x1a4   : > { %p806_p2 = por %p805_p7, %p804_p6 }
 0x1a5   : > { %p802_p13 = pneg %p801_p4 }
 0x1a6   : > { %p808_p1 = por %p807_p8, %p806_p2 }
 0x1a8   : > { %p809_p10 = pnand %p808_p1, %p802_p13 }
 0x1aa   : > { %812 = shalt.err (!%p809_p10)
}
 0x1ab   : > { %611 = dma.vmem_to_hbm [thread:$0]  (%p1201_p12), %s1136_s24, 128, %s1134_s8, %s437_s15  }
 0x1ac PF: > { %s463_s19 = sand.u32 1, %s851_s12   ;;  %p1202_p3 = scmp.ne.s32.totalorder %s1194_s23, 0 }
 0x1ad   : > { %p1203_p5 = scmp.ge.s32.totalorder %s871_s17, 2  ;;  %s464_s20 = scalar_lea.sflag [#allocation4], %s463_s19 }
 0x1af   : > { %p625_p9 = pnand %p1203_p5, %p1202_p3 }
 0x1b1   : > { %846 = dma.done.wait (!%p625_p9), %s464_s20, 128  }
 0x1b2   : > { %848 = vsyncadd (!%p625_p9), %s464_s20, 4294967168  ;;  %s20_s17 = sadd.s32 1, %s871_s17   ;;  %s1204_s12 = smov %s855_s13 }
 0x1b3   : > { %p17_p11 = scmp.ge.s32.totalorder %s20_s17, 4   ;;  %s1205_s13 = smov %s859_s14 }
 0x1b4   : > { %s1206_s14 = smov %s1050_s30  ;;  %s1207_s15 = smov %s867_s16 }
 0x1b5   : > { %s1208_s16 = smov %s1210_s11  ;;  %19 = sbr.rel (!%p17_p11) target bundleno = 7 (0x7), region = 87 }
 0x1bc   :  { %469 = vsyncpa [#allocation3], 1 }
 0x1bd   :  { %471 = vsyncpa [#allocation3 + $0x1], 1 }
 0x1be   :  { %472 = vsyncpa [#allocation6], 1 }
 0x1bf   :  { %473 = vsyncpa [#allocation4], 1 }
 0x1c0   :  { %475 = vsyncpa [#allocation4 + $0x1], 1 }

</bundles_post_ra>
